<compile_context>
chip_gen: v6e
topology: v6e:2x2x1
jax: 0.10.0
libtpu: 0.0.40
codegen_flags: <defaults>
</compile_context>

<pallas_src>
import numpy as np
import jax
import jax.numpy as jnp
from jax import lax
from jax.experimental import pallas as pl
from jax.experimental.pallas import tpu as pltpu


def _sp_kernel(s_ref, t_ref, loss_ref, gs_acc, gt_acc):
    """One reduction step over the feature (D) axis.

    s_ref, t_ref : VMEM f32[(B, tk)]   current feature chunk (student / teacher)
    loss_ref     : VMEM f32[(1, 1)]    scalar output (written on last step)
    gs_acc/gt_acc: VMEM f32[(B, B)]    Gram-matrix accumulators (persist across grid)
    """
    k = pl.program_id(0)

    @pl.when(k == 0)
    def _():
        gs_acc[...] = jnp.zeros_like(gs_acc)
        gt_acc[...] = jnp.zeros_like(gt_acc)

    s = s_ref[...]
    t = t_ref[...]
    # s @ s.T / t @ t.T without materializing a transpose: contract on the
    # last dim of both operands (MXU handles the transposed RHS natively).
    dims = (((1,), (1,)), ((), ()))
    gs_acc[...] += lax.dot_general(s, s, dims, preferred_element_type=jnp.float32)
    gt_acc[...] += lax.dot_general(t, t, dims, preferred_element_type=jnp.float32)

    @pl.when(k == pl.num_programs(0) - 1)
    def _():
        gs = gs_acc[...]
        gt = gt_acc[...]
        eps = jnp.float32(1e-12)  # F.normalize clamp_min(eps)
        ns = gs / jnp.maximum(
            jnp.sqrt(jnp.sum(gs * gs, axis=1, keepdims=True)), eps)
        nt = gt / jnp.maximum(
            jnp.sqrt(jnp.sum(gt * gt, axis=1, keepdims=True)), eps)
        d = ns - nt
        n_elem = jnp.float32(gs.shape[0] * gs.shape[1])
        mse = jnp.sum(d * d) / n_elem
        loss_ref[...] = jnp.reshape(mse, (1, 1))


def sp_loss(fm_s, fm_t, *, block_k=2048):
    """Pallas implementation of SP.forward.

    fm_s, fm_t : f32[B, ...]  (any trailing shape; flattened like .view(B, -1))
    Returns the scalar SP distillation loss.
    """
    assert fm_s.shape[0] == fm_t.shape[0], "batch dims must match"
    B = fm_s.shape[0]
    s = jnp.reshape(fm_s, (B, -1)).astype(jnp.float32)
    t = jnp.reshape(fm_t, (B, -1)).astype(jnp.float32)
    assert s.shape[1] == t.shape[1], "flattened feature dims must match"
    D = s.shape[1]

    # Lane-dense reduction tiles: tk is a multiple of 128 (lane axis), capped
    # at block_k so double-buffered in-blocks stay small on v5e/v7x scoped
    # VMEM.  Zero-pad D up to a multiple of tk — zero columns do not change
    # the Gram matrices.
    tk = min(block_k, max(128, pl.cdiv(D, 128) * 128))
    tk = (tk // 128) * 128
    d_pad = pl.cdiv(D, tk) * tk
    if d_pad != D:
        pad = ((0, 0), (0, d_pad - D))
        s = jnp.pad(s, pad)
        t = jnp.pad(t, pad)
    grid_k = d_pad // tk

    grid_spec = pltpu.PrefetchScalarGridSpec(
        num_scalar_prefetch=0,
        grid=(grid_k,),
        in_specs=[
            pl.BlockSpec((B, tk), lambda k: (0, k)),
            pl.BlockSpec((B, tk), lambda k: (0, k)),
        ],
        out_specs=pl.BlockSpec((1, 1), lambda k: (0, 0)),
        scratch_shapes=[
            pltpu.VMEM((B, B), jnp.float32),
            pltpu.VMEM((B, B), jnp.float32),
        ],
    )

    loss = pl.pallas_call(
        _sp_kernel,
        out_shape=jax.ShapeDtypeStruct((1, 1), jnp.float32),
        grid_spec=grid_spec,
        compiler_params=pltpu.CompilerParams(
            dimension_semantics=("arbitrary",)),  # D is a reduction axis
    )(s, t)
    return loss[0, 0]


def _reference_sp(fm_s, fm_t):
    """Numpy (float64) reference matching the PyTorch SP.forward semantics."""
    b = fm_s.shape[0]
    s = np.asarray(fm_s, np.float64).reshape(b, -1)
    t = np.asarray(fm_t, np.float64).reshape(b, -1)
    gs = s @ s.T
    gt = t @ t.T
    ns = gs / np.maximum(np.linalg.norm(gs, axis=1, keepdims=True), 1e-12)
    nt = gt / np.maximum(np.linalg.norm(gt, axis=1, keepdims=True), 1e-12)
    return float(np.mean((ns - nt) ** 2))


if __name__ == "__main__":
    key = jax.random.PRNGKey(0)
    ks, kt = jax.random.split(key)
    B, C, H, W = 2, 4, 16, 16
    fm_s = jax.random.uniform(ks, (B, C, H, W), dtype=jnp.float32)
    fm_t = jax.random.uniform(kt, (B, C, H, W), dtype=jnp.float32)

    loss = jax.block_until_ready(sp_loss(fm_s, fm_t))

    ref = _reference_sp(np.asarray(fm_s), np.asarray(fm_t))
    np.testing.assert_allclose(float(loss), ref, rtol=5e-2, atol=1e-6)

    print("KERNEL_OK")
</pallas_src>

<mosaic_0001>
module attributes {stable_mosaic.version = 11 : i64} {
  func.func @_sp_kernel(%arg0: i32, %arg1: memref<2x1024xf32, #tpu.memory_space<vmem>>, %arg2: memref<2x1024xf32, #tpu.memory_space<vmem>>, %arg3: memref<1x1xf32, #tpu.memory_space<vmem>>, %arg4: memref<2x2xf32, #tpu.memory_space<vmem>>, %arg5: memref<2x2xf32, #tpu.memory_space<vmem>>) attributes {dimension_semantics = [#tpu.dimension_semantics<arbitrary>], iteration_bounds = array<i64: 1>, scalar_prefetch = 0 : i64, scratch_operands = 2 : i64, tpu.core_type = #tpu.core_type<tc>, window_params = [{transform_indices = @transform_0, window_bounds = array<i64: 2, 1024>}, {transform_indices = @transform_1, window_bounds = array<i64: 2, 1024>}, {pipeline_mode = #tpu.pipeline_mode<synchronous>, transform_indices = @transform_2, window_bounds = array<i64: 1, 1>}]} {
    %c0_i32 = arith.constant 0 : i32
    %0 = arith.cmpi eq, %arg0, %c0_i32 : i32
    %1 = arith.extui %0 : i1 to i32
    %c0_i32_0 = arith.constant 0 : i32
    %2 = arith.cmpi ne, %1, %c0_i32_0 : i32
    scf.if %2 {
      %cst_15 = arith.constant 0.000000e+00 : f32
      %16 = vector.broadcast %cst_15 : f32 to vector<2x2xf32>
      %c0_16 = arith.constant 0 : index
      %c0_17 = arith.constant 0 : index
      %17 = vector.load %arg4[%c0_16, %c0_17] : memref<2x2xf32, #tpu.memory_space<vmem>>, vector<2x2xf32>
      tpu.vector_store %arg4[%c0_16, %c0_17], %16 {strides = array<i32>} : memref<2x2xf32, #tpu.memory_space<vmem>>, vector<2x2xf32>,
      %cst_18 = arith.constant 0.000000e+00 : f32
      %18 = vector.broadcast %cst_18 : f32 to vector<2x2xf32>
      %c0_19 = arith.constant 0 : index
      %c0_20 = arith.constant 0 : index
      %19 = vector.load %arg5[%c0_19, %c0_20] : memref<2x2xf32, #tpu.memory_space<vmem>>, vector<2x2xf32>
      tpu.vector_store %arg5[%c0_19, %c0_20], %18 {strides = array<i32>} : memref<2x2xf32, #tpu.memory_space<vmem>>, vector<2x2xf32>,
    } else {
    }
    %c0 = arith.constant 0 : index
    %c0_1 = arith.constant 0 : index
    %3 = vector.load %arg1[%c0, %c0_1] : memref<2x1024xf32, #tpu.memory_space<vmem>>, vector<2x1024xf32>
    %c0_2 = arith.constant 0 : index
    %c0_3 = arith.constant 0 : index
    %4 = vector.load %arg2[%c0_2, %c0_3] : memref<2x1024xf32, #tpu.memory_space<vmem>>, vector<2x1024xf32>
    %c0_4 = arith.constant 0 : index
    %c0_5 = arith.constant 0 : index
    %5 = vector.load %arg4[%c0_4, %c0_5] : memref<2x2xf32, #tpu.memory_space<vmem>>, vector<2x2xf32>
    %cst = arith.constant dense<0.000000e+00> : vector<2x2xf32>
    %6 = tpu.matmul %3, %3, %cst {dimension_numbers = #tpu.dot_dimension_numbers<[1], [1], [0], [0], [0, 0, 1, 0], [], []>} : vector<2x1024xf32>, vector<2x1024xf32>, vector<2x2xf32> -> vector<2x2xf32>
    %7 = arith.addf %5, %6 : vector<2x2xf32>
    %c0_6 = arith.constant 0 : index
    %c0_7 = arith.constant 0 : index
    %8 = vector.load %arg4[%c0_6, %c0_7] : memref<2x2xf32, #tpu.memory_space<vmem>>, vector<2x2xf32>
    tpu.vector_store %arg4[%c0_6, %c0_7], %7 {strides = array<i32>} : memref<2x2xf32, #tpu.memory_space<vmem>>, vector<2x2xf32>,
    %c0_8 = arith.constant 0 : index
    %c0_9 = arith.constant 0 : index
    %9 = vector.load %arg5[%c0_8, %c0_9] : memref<2x2xf32, #tpu.memory_space<vmem>>, vector<2x2xf32>
    %cst_10 = arith.constant dense<0.000000e+00> : vector<2x2xf32>
    %10 = tpu.matmul %4, %4, %cst_10 {dimension_numbers = #tpu.dot_dimension_numbers<[1], [1], [0], [0], [0, 0, 1, 0], [], []>} : vector<2x1024xf32>, vector<2x1024xf32>, vector<2x2xf32> -> vector<2x2xf32>
    %11 = arith.addf %9, %10 : vector<2x2xf32>
    %c0_11 = arith.constant 0 : index
    %c0_12 = arith.constant 0 : index
    %12 = vector.load %arg5[%c0_11, %c0_12] : memref<2x2xf32, #tpu.memory_space<vmem>>, vector<2x2xf32>
    tpu.vector_store %arg5[%c0_11, %c0_12], %11 {strides = array<i32>} : memref<2x2xf32, #tpu.memory_space<vmem>>, vector<2x2xf32>,
    %c0_i32_13 = arith.constant 0 : i32
    %13 = arith.cmpi eq, %arg0, %c0_i32_13 : i32
    %14 = arith.extui %13 : i1 to i32
    %c0_i32_14 = arith.constant 0 : i32
    %15 = arith.cmpi ne, %14, %c0_i32_14 : i32
    scf.if %15 {
      %c0_15 = arith.constant 0 : index
      %c0_16 = arith.constant 0 : index
      %16 = vector.load %arg4[%c0_15, %c0_16] : memref<2x2xf32, #tpu.memory_space<vmem>>, vector<2x2xf32>
      %c0_17 = arith.constant 0 : index
      %c0_18 = arith.constant 0 : index
      %17 = vector.load %arg5[%c0_17, %c0_18] : memref<2x2xf32, #tpu.memory_space<vmem>>, vector<2x2xf32>
      %18 = arith.mulf %16, %16 : vector<2x2xf32>
      %cst_19 = arith.constant dense<0.000000e+00> : vector<2xf32>
      %19 = vector.multi_reduction <add>, %18, %cst_19 [1] : vector<2x2xf32> to vector<2xf32>
      %20 = vector.shape_cast %19 : vector<2xf32> to vector<2x1xf32>
      %21 = math.sqrt %20 : vector<2x1xf32>
      %cst_20 = arith.constant 9.99999996E-13 : f32
      %22 = vector.broadcast %cst_20 : f32 to vector<2x1xf32>
      %23 = arith.maximumf %21, %22 : vector<2x1xf32>
      %24 = vector.broadcast %23 : vector<2x1xf32> to vector<2x2xf32>
      %25 = arith.divf %16, %24 : vector<2x2xf32>
      %26 = arith.mulf %17, %17 : vector<2x2xf32>
      %cst_21 = arith.constant dense<0.000000e+00> : vector<2xf32>
      %27 = vector.multi_reduction <add>, %26, %cst_21 [1] : vector<2x2xf32> to vector<2xf32>
      %28 = vector.shape_cast %27 : vector<2xf32> to vector<2x1xf32>
      %29 = math.sqrt %28 : vector<2x1xf32>
      %cst_22 = arith.constant 9.99999996E-13 : f32
      %30 = vector.broadcast %cst_22 : f32 to vector<2x1xf32>
      %31 = arith.maximumf %29, %30 : vector<2x1xf32>
      %32 = vector.broadcast %31 : vector<2x1xf32> to vector<2x2xf32>
      %33 = arith.divf %17, %32 : vector<2x2xf32>
      %34 = arith.subf %25, %33 : vector<2x2xf32>
      %35 = arith.mulf %34, %34 : vector<2x2xf32>
      %36 = vector.shape_cast %35 : vector<2x2xf32> to vector<1x2x2xf32>
      %cst_23 = arith.constant dense<0.000000e+00> : vector<1xf32>
      %37 = vector.multi_reduction <add>, %36, %cst_23 [1, 2] : vector<1x2x2xf32> to vector<1xf32>
      %38 = vector.shape_cast %37 : vector<1xf32> to vector<1x1x1xf32>
      %39 = vector.extract %38[0, 0, 0] : f32 from vector<1x1x1xf32>
      %cst_24 = arith.constant 4.000000e+00 : f32
      %40 = arith.divf %39, %cst_24 : f32
      %41 = vector.broadcast %40 : f32 to vector<1x1xf32>
      %c0_25 = arith.constant 0 : index
      %c0_26 = arith.constant 0 : index
      %42 = vector.load %arg3[%c0_25, %c0_26] : memref<1x1xf32, #tpu.memory_space<vmem>>, vector<1x1xf32>
      tpu.vector_store %arg3[%c0_25, %c0_26], %41 {strides = array<i32>} : memref<1x1xf32, #tpu.memory_space<vmem>>, vector<1x1xf32>,
    } else {
    }
    return
  }
  func.func @transform_0(%arg0: i32) -> (i32, i32) {
    %c0_i32 = arith.constant 0 : i32
    %c0_i32_0 = arith.constant 0 : i32
    return %c0_i32, %arg0 : i32, i32
  }
  func.func @transform_1(%arg0: i32) -> (i32, i32) {
    %c0_i32 = arith.constant 0 : i32
    %c0_i32_0 = arith.constant 0 : i32
    return %c0_i32, %arg0 : i32, i32
  }
  func.func @transform_2(%arg0: i32) -> (i32, i32) {
    %c0_i32 = arith.constant 0 : i32
    %c0_i32_0 = arith.constant 0 : i32
    %c0_i32_1 = arith.constant 0 : i32
    return %c0_i32, %c0_i32_0 : i32, i32
  }
}

</mosaic_0001>

<bundles_post_ra>
// kernel: tpu_custom_call.1
= control target key start
LH: loop header
LB: loop body
LE: loop exit
PB: predicated region body
PF: predicated region fallthrough
CT: control target
= control target key end

     0   :  { %7 = vsyncpa [#allocation5], 0  ;;  %s890_s0 = inlined_call_operand.hbm [shape: f32[2,1024], index: 0, kind: input, shape index: {}]   ;;  %s891_s1 = inlined_call_operand.hbm [shape: f32[2,1024], index: 1, kind: input, shape index: {}]   ;;  %s892_s2 = inlined_call_operand.hbm [shape: f32[1,1], index: 2, kind: output, shape index: {}]  }
   0x1   :  { %8 = vsyncpa [#allocation8], 0 }
   0x2   :  { %9 = vsyncpa [#allocation6], 0  ;;  %s854_s9 = smov [#allocation4]   ;;  %s855_s11 = smov [#allocation7]  }
   0x3   :  { %s16_s10 = sshll.u32 %s854_s9, 4  ;;  %s26_s12 = sshll.u32 %s855_s11, 4  ;;  %s17_s10 = int_to_ptr.vmem [resolvable:$true] %s16_s10  ;;  %s27_s12 = int_to_ptr.vmem [resolvable:$true] %s26_s12 }
   0x4   :  { %s796_s13 = scalar_lea.vmem %s17_s10, 256  ;;  %p801_p1 = scmp.lt.s32.totalorder %s17_s10, %s17_s10 }
   0x5   :  { %p797_p0 = scmp.ne.s32.totalorder %s17_s10, %s796_s13  ;;  %p802_p2 = scmp.lt.s32.totalorder %s796_s13, %s796_s13 }
   0x7   :  { %p803_p3 = por %p802_p2, %p801_p1 }
   0x9   :  { %p804_p4 = pnand %p803_p3, %p797_p0 }
   0xb   :  { %807 = shalt.err (!%p804_p4)
}
   0xc   :  { %19 = dma.hbm_to_vmem [thread:$0]  %s890_s0, 256, %s17_s10, [#allocation5]  }
   0xd   :  { %s816_s16 = scalar_lea.vmem %s27_s12, 256  ;;  %p821_p6 = scmp.lt.s32.totalorder %s27_s12, %s27_s12 }
   0xe   :  { %p817_p5 = scmp.ne.s32.totalorder %s27_s12, %s816_s16  ;;  %p822_p7 = scmp.lt.s32.totalorder %s816_s16, %s816_s16 }
  0x10   :  { %p823_p8 = por %p822_p7, %p821_p6 }
  0x12   :  { %p824_p9 = pnand %p823_p8, %p817_p5 }
  0x14   :  { %827 = shalt.err (!%p824_p9)
}
  0x15   :  { %29 = dma.hbm_to_vmem [thread:$0]  %s891_s1, 256, %s27_s12, [#allocation8]  }
  0x16   :  { %848 = dma.done.wait [#allocation5], 256  }
  0x17   :  { %849 = vsyncadd [#allocation5], 4294967040 }
  0x18   :  { %850 = dma.done.wait [#allocation8], 256  }
  0x19   :  { %851 = vsyncadd [#allocation8], 4294967040  ;;  %v54_v0 = vlaneseq  ;;  %v856_v1 = vmov 1983009808   ;;  %v43_v6 = vld [vmem:[#allocation4] sm:$0xff]  ;;  %v44_v7 = vld [vmem:[#allocation4 + $0x8] sm:$0xff] }
  0x1a   :  { %v52_v2 = vunpack.c.l.s4 %v856_v1  ;;  %v45_v8 = vld [vmem:[#allocation7] sm:$0xff]  ;;  %v50_v10 = vcombine.high %v43_v6, %v43_v6  ;;  %v67_v12 = vcombine.high %v44_v7, %v44_v7  ;;  %v46_v13 = vld [vmem:[#allocation7 + $0x8] sm:$0xff]  ;;  %vm40_vm0 = vcmask 9216   ;;  %s858_s0 = smov [#allocation9]  }
  0x1b   :  { %v55_v3 = vshrl.u32 %v54_v0, 7  ;;  %v378_v15 = vcombine.high %v45_v8, %v45_v8  ;;  %v395_v20 = vcombine.high %v46_v13, %v46_v13  ;;  %v857_v30 = vmov 0.0   ;;  %s759_s1 = sshll.u32 %s858_s0, 4  ;;  %s760_s1 = int_to_ptr.vmem [resolvable:$true] %s759_s1 }
  0x1c   :  { %v53_v4 = vunpack.c.0.s8 %v52_v2  ;;  %41 = vst.msk [vmem:[#allocation2] sm:$0x3] %vm40_vm0, %v857_v30  ;;  %42 = vst.msk [vmem:[#allocation3] sm:$0x3] %vm40_vm0, %v857_v30  ;;  %vm751_vm5 = vcmask 0   ;;  %s828_s21 = scalar_lea.vmem %s760_s1, 16  ;;  %p833_p11 = scmp.lt.s32.totalorder %s760_s1, %s760_s1 }
  0x1d   :  { %p829_p10 = scmp.ne.s32.totalorder %s760_s1, %s828_s21  ;;  %s832_s22 = scalar_lea.vmem %s760_s1, 32 }
  0x1e   :  { %v56_v5 = vsub.s32 %v53_v4, %v55_v3  ;;  %p834_p12 = scmp.lt.s32.totalorder %s832_s22, %s828_s21 }
  0x20   :  { %v57_v9 = vrot.slane %v43_v6, %v56_v5  ;;  %v74_v11 = vrot.slane %v44_v7, %v56_v5  ;;  %v385_v14 = vrot.slane %v45_v8, %v56_v5  ;;  %v64_v17 = vrot.slane %v50_v10, %v56_v5  ;;  %p835_p13 = por %p834_p12, %p833_p11 }
  0x21   :  { %v81_v19 = vrot.slane %v67_v12, %v56_v5  ;;  %v392_v23 = vrot.slane %v378_v15, %v56_v5  ;;  %v402_v25 = vrot.slane %v46_v13, %v56_v5  ;;  %v409_v27 = vrot.slane %v395_v20, %v56_v5 }
  0x22   :  { %v65_v16 = vcombine.high %v57_v9, %v57_v9  ;;  %v82_v18 = vcombine.high %v74_v11, %v74_v11  ;;  %v66_v21 = vcombine.high %v64_v17, %v64_v17  ;;  %v393_v24 = vcombine.high %v385_v14, %v385_v14  ;;  %p836_p0 = pnand %p835_p13, %p829_p10 }
  0x23   :  { %v83_v22 = vcombine.high %v81_v19, %v81_v19  ;;  %v394_v26 = vcombine.high %v392_v23, %v392_v23  ;;  %v410_v28 = vcombine.high %v402_v25, %v402_v25  ;;  %v411_v29 = vcombine.high %v409_v27, %v409_v27  ;;  %v47_v39 = vld [vmem:[#allocation2] sm:$0x3]  ;;  %v375_v52 = vld [vmem:[#allocation3] sm:$0x3] }
  0x24   :  { %122 = vmatprep.subr.mxu0 %v65_v16  ;;  %156 = vmatprep.mubr.f32.mxu0 %v65_v16 }
  0x25   :  { %123 = vmatpush1.xpose.msra.mxu0 %v57_v9  ;;  %192 = vmatprep.subr.mxu1 %v66_v21 }
  0x26   :  { %262 = vmatprep.subr.mxu0 %v82_v18  ;;  %193 = vmatpush1.xpose.msra.mxu1 %v64_v17 }
  0x27   :  { %226 = vmatprep.mubr.f32.mxu1 %v66_v21  ;;  %332 = vmatprep.subr.mxu1 %v83_v22 }
  0x28   :  { %157 = vmatmul.mubr.f32.vlgmr.msra.gmra.mxu0 %v57_v9 }
  0x29   :  { %263 = vmatpush1.xpose.msra.mxu0 %v74_v11  ;;  %296 = vmatprep.mubr.f32.mxu0 %v82_v18 }
  0x2a   :  { %227 = vmatmul.mubr.f32.vlgmr.msra.gmra.mxu1 %v64_v17  ;;  %450 = vmatprep.subr.mxu0 %v393_v24 }
  0x2b   :  { %333 = vmatpush1.xpose.msra.mxu1 %v81_v19  ;;  %366 = vmatprep.mubr.f32.mxu1 %v83_v22 }
  0x2c   :  { %297 = vmatmul.mubr.f32.vlgmr.msra.gmra.mxu0 %v74_v11  ;;  %520 = vmatprep.subr.mxu1 %v394_v26 }
  0x2d   :  { %451 = vmatpush1.xpose.msra.mxu0 %v385_v14  ;;  %484 = vmatprep.mubr.f32.mxu0 %v393_v24 }
  0x2e   :  { %367 = vmatmul.mubr.f32.vlgmr.msra.gmra.mxu1 %v81_v19  ;;  %590 = vmatprep.subr.mxu0 %v410_v28 }
  0x2f   :  { %521 = vmatpush1.xpose.msra.mxu1 %v392_v23  ;;  %554 = vmatprep.mubr.f32.mxu1 %v394_v26 }
  0x30   :  { %485 = vmatmul.mubr.f32.vlgmr.msra.gmra.mxu0 %v385_v14  ;;  %660 = vmatprep.subr.mxu1 %v411_v29 }
  0x31   :  { %591 = vmatpush1.xpose.msra.mxu0 %v402_v25  ;;  %624 = vmatprep.mubr.f32.mxu0 %v410_v28 }
  0x32   :  { %555 = vmatmul.mubr.f32.vlgmr.msra.gmra.mxu1 %v392_v23 }
  0x33   :  { %661 = vmatpush1.xpose.msra.mxu1 %v409_v27  ;;  %694 = vmatprep.mubr.f32.mxu1 %v411_v29 }
  0x34   :  { %625 = vmatmul.mubr.f32.vlgmr.msra.gmra.mxu0 %v402_v25 }
  0x36   :  { %695 = vmatmul.mubr.f32.vlgmr.msra.gmra.mxu1 %v409_v27 }
  0xe8   :  { %v158_v31 = vpop.f32.mrf.mxu0 }
  0xea   :  { %v160_v32 = vpop.f32.mrf.mxu0  ;;  %v228_v33 = vpop.f32.mrf.mxu1 }
  0xeb   :  { %v229_v34 = vadd.f32 %v228_v33, %v158_v31 }
  0xec   :  { %v230_v35 = vpop.f32.mrf.mxu1  ;;  %v298_v36 = vpop.f32.mrf.mxu0 }
  0xed   :  { %v299_v37 = vadd.f32 %v298_v36, %v229_v34 }
  0xee   :  { %v300_v38 = vpop.f32.mrf.mxu0  ;;  %v368_v40 = vpop.f32.mrf.mxu1 }
  0xef   :  { %v369_v41 = vadd.f32 %v368_v40, %v299_v37 }
  0xf0   :  { %v370_v42 = vpop.f32.mrf.mxu1  ;;  %v486_v43 = vpop.f32.mrf.mxu0 }
  0xf1   :  { %v372_v44 = vadd.f32 %v369_v41, %v47_v39 }
  0xf2   :  { %v488_v45 = vpop.f32.mrf.mxu0  ;;  %v556_v46 = vpop.f32.mrf.mxu1 }
  0xf3   :  { %374 = vst.msk [vmem:[#allocation2] sm:$0x3] %vm40_vm0, %v372_v44  ;;  %v557_v47 = vadd.f32 %v556_v46, %v486_v43 }
  0xf4   :  { %v558_v48 = vpop.f32.mrf.mxu1  ;;  %v626_v49 = vpop.f32.mrf.mxu0 }
  0xf5   :  { %v627_v50 = vadd.f32 %v626_v49, %v557_v47 }
  0xf6   :  { %v628_v51 = vpop.f32.mrf.mxu0  ;;  %v696_v53 = vpop.f32.mrf.mxu1 }
  0xf7   :  { %v697_v54 = vadd.f32 %v696_v53, %v627_v50 }
  0xf8   :  { %v698_v55 = vpop.f32.mrf.mxu1 }
  0xf9   :  { %v700_v56 = vadd.f32 %v697_v54, %v375_v52 }
  0xfa   :  { %v705_v57 = vld [vmem:[#allocation2] sm:$0x3] }
  0xfb   :  { %701 = vst.msk [vmem:[#allocation3] sm:$0x3] %vm40_vm0, %v700_v56  ;;  %v707_v58 = vmul.f32 %v705_v57, %v705_v57 }
  0xfd   :  { %v708_v59 = vsel %vm40_vm0, %v707_v58, 0.0 }
  0xfe   :  { %709 = vadd.xlane.f32.xlu0 %v708_v59 }
 0x102   :  { %v706_v60 = vld [vmem:[#allocation3] sm:$0x3] }
 0x103   :  { %v721_v61 = vmul.f32 %v706_v60, %v706_v60 }
 0x105   :  { %v722_v62 = vsel %vm40_vm0, %v721_v61, 0.0 }
 0x106   :  { %723 = vadd.xlane.f32.xlu0 %v722_v62 }
 0x187   :  { %v710_v63 = vpop.xlane.xlu0 %709 }
 0x188   :  { %780 = vrsqrt.f32 %v710_v63  ;;  %vm713_vm1 = vcmp.eq.f32.partialorder %v710_v63, inf  ;;  %v716_v4 = vand.u32 2147483648, %v710_v63  ;;  %vm715_vm2 = vcmp.eq.f32.partialorder %v710_v63, 0.0 }
 0x18f   :  { %v724_v0 = vpop.xlane.xlu0 %723 }
 0x190   :  { %782 = vrsqrt.f32 %v724_v0  ;;  %vm727_vm3 = vcmp.eq.f32.partialorder %v724_v0, inf  ;;  %v730_v9 = vand.u32 2147483648, %v724_v0  ;;  %vm729_vm4 = vcmp.eq.f32.partialorder %v724_v0, 0.0 }
 0x195   :  { %v781_v1 = vpop.eup %780 }
 0x196   :  { %v712_v2 = vmul.f32 %v781_v1, %v710_v63 }
 0x198   :  { %v714_v3 = vsel %vm713_vm1, %v710_v63, %v712_v2 }
 0x199   :  { %v717_v5 = vsel %vm715_vm2, %v716_v4, %v714_v3 }
 0x19a   :  { %v718_v7 = vmax.f32 %v717_v5, 1e-12 }
 0x19c   :  { %784 = vrcp.f32 %v718_v7 }
 0x19d   :  { %v783_v6 = vpop.eup %782 }
 0x19e   :  { %v726_v8 = vmul.f32 %v783_v6, %v724_v0 }
 0x1a0   :  { %v728_v10 = vsel %vm727_vm3, %v724_v0, %v726_v8 }
 0x1a1   :  { %v731_v11 = vsel %vm729_vm4, %v730_v9, %v728_v10 }
 0x1a2   :  { %v732_v12 = vmax.f32 %v731_v11, 1e-12 }
 0x1a4   :  { %786 = vrcp.f32 %v732_v12 }
 0x1a9   :  { %v785_v13 = vpop.eup %784 }
 0x1aa   :  { %v720_v15 = vmul.f32 %v785_v13, %v705_v57 }
 0x1b1   :  { %v787_v14 = vpop.eup %786 }
 0x1b2   :  { %v734_v16 = vmul.f32 %v787_v14, %v706_v60 }
 0x1b4   :  { %v735_v17 = vsub.f32 %v720_v15, %v734_v16 }
 0x1b6   :  { %v736_v18 = vmul.f32 %v735_v17, %v735_v17 }
 0x1b8   :  { %v737_v19 = vsel %vm40_vm0, %v736_v18, 0.0 }
 0x1b9   :  { %738 = vadd.xlane.f32.xlu1 %v737_v19 }
 0x242   :  { %v739_v20 = vpop.xlane.xlu1 %738 }
 0x243   :  { %v740_v21 = vrot.slane %v739_v20, 4 }
 0x245   :  { %v741_v22 = vadd.f32 %v740_v21, %v739_v20 }
 0x247   :  { %v742_v23 = vrot.slane %v741_v22, 2 }
 0x249   :  { %v743_v24 = vadd.f32 %v742_v23, %v741_v22 }
 0x24b   :  { %v744_v25 = vrot.slane %v743_v24, 1 }
 0x24d   :  { %v745_v26 = vadd.f32 %v744_v25, %v743_v24 }
 0x24f   :  { %769 = vpush %v745_v26 }
 0x280   :  { %s770_s19 = spop %769 }
 0x281   :  { %s749_s20 = smul.f32 0.25, %s770_s19 }
 0x283   :  { %v750_v27 = vstv %s749_s20 }
 0x284   :  { %752 = vst.msk [vmem:[#allocation9] sm:$0x1] %vm751_vm5, %v750_v27 }
 0x285   :  { %839 = shalt.err (!%p836_p0)
}
 0x286   :  { %762 = dma.vmem_to_hbm [thread:$0]  %s760_s1, 16, %s892_s2, [#allocation6]  }
 0x287   :  { %852 = dma.done.wait [#allocation6], 16  }
 0x288   :  { %853 = vsyncadd [#allocation6], 4294967280 }
 0x289   :  { %766 = vsyncpa [#allocation5], 1 }
 0x28a   :  { %767 = vsyncpa [#allocation8], 1 }
 0x28b   :  { %768 = vsyncpa [#allocation6], 1 }

</bundles_post_ra>
